<compile_context>
chip_gen: v7x
topology: tpu7x:2x2x1
jax: 0.10.0
libtpu: 0.0.40
codegen_flags: <defaults>
</compile_context>

<pallas_src>
import functools

import jax
import jax.numpy as jnp
from jax.experimental import pallas as pl
from jax.experimental.pallas import tpu as pltpu

TINY_EPSILON = 1e-8   # matches the reference repo's TINY_EPSILON
T_MAX = 1e8

_TARGET_BLOCK_BYTES = 8 * 1024 * 1024      # ~8 MiB blocks: per-step overhead <3%
_DEFAULT_VMEM_BYTES = 64 * 1024 * 1024     # v7x per-core VMEM = safe lower bound
_MAX_LANE_FOLD = 16384                     # widest trailing dim we fold to


def _temperature_scale_kernel(inv_t_ref, x_ref, o_ref, *, compute_dtype):
    # inv_t_ref: (1,) f32 in SMEM = 1 / clamp(T, TINY_EPSILON, 1e8)
    # x_ref / o_ref: (tile_rows, cols) VMEM tiles
    scale = inv_t_ref[0].astype(compute_dtype)
    o_ref[...] = (x_ref[...].astype(compute_dtype) * scale).astype(o_ref.dtype)


def _tpu_budget():
    """(per-core VMEM bytes, TensorCores per device, has bf16 VALU) — defensive."""
    vmem = _DEFAULT_VMEM_BYTES
    try:
        cap = getattr(pltpu.get_tpu_info(), "vmem_capacity_bytes", None)
        if cap:
            vmem = int(cap)
    except Exception:
        pass
    num_tc, bf16_valu = 1, False
    try:
        kind = (jax.devices()[0].device_kind or "").lower()
        if any(tag in kind for tag in ("v4", "v5p", "v7")):
            num_tc = 2                      # megacore / dual-TC: balance the grid
        if any(tag in kind for tag in ("v6", "v7")):
            bf16_valu = True                # native bf16 VPU path
    except Exception:
        pass
    return vmem, num_tc, bf16_valu


def _pick_layout(n_total):
    """Lane-dense 2-D slab (rows, cols).  Returns None when no layout with a
    >=128-lane trailing dim exists (tiny / prime element counts)."""
    if n_total % 128 == 0:
        cols = 128
        for w in (8192, 4096, 2048, 1024, 512, 256):
            if n_total % w == 0:
                cols = w
                break
        return n_total // cols, cols
    # Ragged count: fold trailing dims into the largest divisor >= 128 so only
    # the per-row tail vreg is masked (instead of every store).
    for d in range(min(n_total, _MAX_LANE_FOLD), 127, -1):
        if n_total % d == 0:
            return n_total // d, d
    return None


def _pick_tile_rows(rows, cols, itemsize, target_bytes, num_tc):
    """Byte-budgeted, sublane-aligned row tile; even/balanced grid on 2-TC chips."""
    sublane = {1: 32, 2: 16}.get(itemsize, 8)
    row_bytes = cols * itemsize
    t = min(rows, max(1, target_bytes // row_bytes))
    if t < rows:
        t = max(sublane, (t // sublane) * sublane)
    steps = -(-rows // t)
    if num_tc > 1 and steps <= 8 and rows > sublane:
        # Round the step count up to a multiple of num_tc and re-balance so both
        # TensorCores move (nearly) the same number of bytes.
        steps = -(-steps // num_tc) * num_tc
        t = -(-rows // steps)
        t = min(rows, max(sublane, -(-t // sublane) * sublane))
    return t


def temperature_scaler(x, temperature, mode="both", training=False, inplace=False):
    """Pallas implementation of TemperatureScaler.forward."""
    assert mode in ("train", "eval", "both")
    apply_scale = (
        mode == "both"
        or (mode == "train" and training)
        or (mode == "eval" and not training)
    )
    if not apply_scale:
        return x

    # clamp + reciprocal once, on the f32 scalar (the kernel then does a single
    # broadcast multiply per vreg).  Note: recip-then-mul differs from a true
    # divide by ~1 ulp, which is inside the tolerances used below.
    t_f32 = jnp.asarray(temperature, dtype=jnp.float32)
    inv_t = (1.0 / jnp.clip(t_f32, TINY_EPSILON, T_MAX)).reshape(1)

    n_total = x.size
    layout = _pick_layout(n_total) if n_total >= 128 else None
    if layout is None:
        # Tiny / prime-sized inputs: a Pallas kernel here would only emit masked
        # (<128-lane) stores, so let XLA handle the single multiply.
        return (x * inv_t[0]).astype(x.dtype)

    rows, cols = layout
    x2 = x.reshape(rows, cols)              # contiguous reshape: no HBM copy
    itemsize = x2.dtype.itemsize

    vmem_cap, num_tc, bf16_valu = _tpu_budget()
    target = min(_TARGET_BLOCK_BYTES, max(2 << 20, vmem_cap // 6))
    tile_rows = _pick_tile_rows(rows, cols, itemsize, target, num_tc)
    grid = (pl.cdiv(rows, tile_rows),)      # ragged last block handled by Pallas

    block_bytes = tile_rows * cols * itemsize
    # in + out double-buffered (4 blocks) plus headroom, never above 3/4 of
    # this generation's per-core VMEM (64 MiB on v7x, 128 MiB on v5e/v6e).
    vmem_limit = int(min(vmem_cap * 3 // 4, max(32 << 20, 6 * block_bytes)))

    # bf16 multiplies natively on chips with a bf16 VALU (v6e/v7x); everything
    # else computes in f32 and casts back (output keeps x.dtype either way).
    compute_dtype = x2.dtype if (x2.dtype == jnp.bfloat16 and bf16_valu) else jnp.float32

    out = pl.pallas_call(
        functools.partial(_temperature_scale_kernel, compute_dtype=compute_dtype),
        out_shape=jax.ShapeDtypeStruct((rows, cols), x.dtype),
        grid=grid,
        in_specs=[
            pl.BlockSpec(memory_space=pltpu.MemorySpace.SMEM),   # scalar 1/T
            pl.BlockSpec((tile_rows, cols), lambda i: (i, 0)),
        ],
        out_specs=pl.BlockSpec((tile_rows, cols), lambda i: (i, 0)),
        input_output_aliases=({1: 0} if inplace else {}),
        compiler_params=pltpu.CompilerParams(
            dimension_semantics=("parallel",),
            vmem_limit_bytes=vmem_limit,
        ),
    )(inv_t, x2)

    return out.reshape(x.shape)


if __name__ == "__main__":
    key = jax.random.PRNGKey(0)
    k1, k2, k3, k4 = jax.random.split(key, 4)
    temperature = jnp.float32(1.5)
    t_clamped = jnp.clip(temperature, TINY_EPSILON, T_MAX)

    # 1) (batch=16, num_classes=1000) f32 logits: 16000 elems -> lane-dense
    #    (125, 128) slab; grid balanced to an even number of steps on 2-TC chips.
    x1 = jax.random.normal(k1, (16, 1000), dtype=jnp.float32)
    y1 = jax.block_until_ready(temperature_scaler(x1, temperature, mode="both"))
    assert y1.shape == x1.shape and y1.dtype == x1.dtype
    assert jnp.allclose(y1, x1 / t_clamped, atol=1e-5, rtol=1e-5), "mismatch (x1)"

    # 2) bf16 logits: native-dtype multiply on v6e/v7x, f32 compute elsewhere.
    x2 = jax.random.normal(k2, (8, 512), dtype=jnp.bfloat16)
    y2 = jax.block_until_ready(temperature_scaler(x2, temperature, mode="both"))
    ref2 = (x2.astype(jnp.float32) / t_clamped).astype(jnp.bfloat16)
    assert y2.dtype == jnp.bfloat16
    assert jnp.allclose(y2.astype(jnp.float32), ref2.astype(jnp.float32),
                        atol=2e-2, rtol=2e-2), "mismatch (x2 bf16)"

    # 3) Tiny ragged shape (3*5*7 = 105 elems, no >=128-lane layout) -> XLA path.
    x3 = jax.random.normal(k3, (3, 5, 7), dtype=jnp.float32)
    y3 = jax.block_until_ready(temperature_scaler(x3, temperature, mode="both"))
    assert jnp.allclose(y3, x3 / t_clamped, atol=1e-5, rtol=1e-5), "mismatch (x3)"

    # 4) Gating: mode='train' while not training -> identity (no kernel launch).
    y4 = temperature_scaler(x1, temperature, mode="train", training=False)
    assert jnp.array_equal(y4, x1)

    # 5) In-place variant: alias x -> out in the kernel and donate at the jit
    #    boundary (halves peak HBM footprint for vocab-sized logits).
    scale_inplace = jax.jit(
        lambda x, t: temperature_scaler(x, t, mode="both", inplace=True),
        donate_argnums=(0,))
    x5 = jax.random.normal(k4, (128, 1024), dtype=jnp.float32)
    ref5 = x5 / t_clamped
    y5 = jax.block_until_ready(scale_inplace(x5, temperature))
    assert jnp.allclose(y5, ref5, atol=1e-5, rtol=1e-5), "mismatch (x5 inplace)"

    print("KERNEL_OK")
</pallas_src>

<mosaic_0001>
module attributes {stable_mosaic.version = 11 : i64} {
  func.func @_temperature_scale_kernel(%arg0: i32, %arg1: memref<1xf32, #tpu.memory_space<smem>>, %arg2: memref<125x128xf32, #tpu.memory_space<vmem>>, %arg3: memref<125x128xf32, #tpu.memory_space<vmem>>) attributes {dimension_semantics = [#tpu.dimension_semantics<parallel>], iteration_bounds = array<i64: 1>, scalar_prefetch = 0 : i64, scratch_operands = 0 : i64, tpu.core_type = #tpu.core_type<tc>, window_params = [{transform_indices = @transform_0, window_bounds = array<i64: 1>}, {transform_indices = @transform_1, window_bounds = array<i64: 125, 128>}, {transform_indices = @transform_2, window_bounds = array<i64: 125, 128>}]} {
    %c0 = arith.constant 0 : index
    %0 = memref.load %arg1[%c0] : memref<1xf32, #tpu.memory_space<smem>>
    %c0_0 = arith.constant 0 : index
    %c0_1 = arith.constant 0 : index
    %1 = vector.load %arg2[%c0_0, %c0_1] : memref<125x128xf32, #tpu.memory_space<vmem>>, vector<125x128xf32>
    %2 = vector.broadcast %0 : f32 to vector<125x128xf32>
    %3 = arith.mulf %1, %2 : vector<125x128xf32>
    %c0_2 = arith.constant 0 : index
    %c0_3 = arith.constant 0 : index
    %4 = vector.load %arg3[%c0_2, %c0_3] : memref<125x128xf32, #tpu.memory_space<vmem>>, vector<125x128xf32>
    tpu.vector_store %arg3[%c0_2, %c0_3], %3 {strides = array<i32>} : memref<125x128xf32, #tpu.memory_space<vmem>>, vector<125x128xf32>,
    return
  }
  func.func @transform_0(%arg0: i32) -> i32 {
    %c0_i32 = arith.constant 0 : i32
    %c0_i32_0 = arith.constant 0 : i32
    return %c0_i32 : i32
  }
  func.func @transform_1(%arg0: i32) -> (i32, i32) {
    %c0_i32 = arith.constant 0 : i32
    %c0_i32_0 = arith.constant 0 : i32
    return %arg0, %c0_i32 : i32, i32
  }
  func.func @transform_2(%arg0: i32) -> (i32, i32) {
    %c0_i32 = arith.constant 0 : i32
    %c0_i32_0 = arith.constant 0 : i32
    return %arg0, %c0_i32 : i32, i32
  }
}

</mosaic_0001>

<bundles_post_ra>
// kernel: tpu_custom_call.1
= control target key start
LH: loop header
LB: loop body
LE: loop exit
PB: predicated region body
PF: predicated region fallthrough
CT: control target
= control target key end

     0   :  { %8 = vsyncpa [#allocation4], 0  ;;  %s198_s0 = inlined_call_operand.<no memory space> [shape: f32[1], index: 0, kind: input, shape index: {}]   ;;  %s199_s1 = inlined_call_operand.hbm [shape: f32[125,128], index: 1, kind: input, shape index: {}]   ;;  %s200_s2 = inlined_call_operand.hbm [shape: f32[125,128], index: 2, kind: output, shape index: {}]  }
   0x1   :  { %9 = vsyncpa [#allocation5], 0  ;;  %s146_s9 = smov [#allocation3]   ;;  %s98_s13 = scalar_lea.hbm %s199_s1, 2048 }
   0x2   :  { %s17_s10 = sshll.u32 %s146_s9, 4  ;;  %p99_p0 = scmp.ne.s32.totalorder %s199_s1, %s98_s13  ;;  %s18_s10 = int_to_ptr.vmem [resolvable:$true] %s17_s10 }
   0x3   :  { %p102_p1 = scmp.lt.u32.totalorder %s98_s13, %s199_s1 }
   0x5   :  { %p104_p2 = pnand %p102_p1, %p99_p0 }
   0x7   :  { %107 = shalt.err (!%p104_p2)
}
   0x8   :  { %s108_s18 = scalar_lea.vmem %s18_s10, 2048  ;;  %p113_p4 = scmp.lt.s32.totalorder %s18_s10, %s18_s10 }
   0x9   :  { %p109_p3 = scmp.ne.s32.totalorder %s18_s10, %s108_s18  ;;  %p114_p5 = scmp.lt.s32.totalorder %s108_s18, %s108_s18 }
   0xb   :  { %p115_p6 = por %p114_p5, %p113_p4 }
   0xd   :  { %p116_p7 = pnand %p115_p6, %p109_p3 }
   0xf   :  { %119 = shalt.err (!%p116_p7)
}
  0x10   :  { %s147_s19 = smov 128   ;;  %s148_s20 = smov 8  }
  0x11   :  { %23 = dma.hbm_to_vmem [thread:$0]  %s199_s1, 2048, %s18_s10, [#allocation4], %s147_s19, %s147_s19, %s148_s20  }
  0x12   :  { %142 = dma.done.wait [#allocation4], 2048  }
  0x13   :  { %143 = vsyncadd [#allocation4], 4294965248  ;;  %v44_v0 = vstv %s198_s0  ;;  %v28_v1 = vld [vmem:[#allocation3] sm:$0xff]  ;;  %v29_v2 = vld [vmem:[#allocation3 + $0x8] sm:$0xff]  ;;  %s149_s0 = smov [#allocation6]  }
  0x14   :  { %v30_v3 = vld [vmem:[#allocation3 + $0x10] sm:$0xff]  ;;  %v45_v4 = vmul.f32 %v44_v0, %v28_v1  ;;  %v46_v5 = vmul.f32 %v44_v0, %v29_v2  ;;  %v31_v7 = vld [vmem:[#allocation3 + $0x18] sm:$0xff]  ;;  %v32_v8 = vld [vmem:[#allocation3 + $0x20] sm:$0xff]  ;;  %s82_s1 = sshll.u32 %s149_s0, 4  ;;  %s83_s1 = int_to_ptr.vmem [resolvable:$true] %s82_s1 }
  0x15   :  { %v47_v6 = vmul.f32 %v44_v0, %v30_v3  ;;  %v33_v9 = vld [vmem:[#allocation3 + $0x28] sm:$0xff]  ;;  %v48_v10 = vmul.f32 %v44_v0, %v31_v7  ;;  %v49_v11 = vmul.f32 %v44_v0, %v32_v8  ;;  %v34_v13 = vld [vmem:[#allocation3 + $0x30] sm:$0xff]  ;;  %v35_v14 = vld [vmem:[#allocation3 + $0x38] sm:$0xff]  ;;  %s120_s25 = scalar_lea.vmem %s83_s1, 2048  ;;  %p125_p9 = scmp.lt.s32.totalorder %s83_s1, %s83_s1 }
  0x16   :  { %v50_v12 = vmul.f32 %v44_v0, %v33_v9  ;;  %v36_v15 = vld [vmem:[#allocation3 + $0x40] sm:$0xff]  ;;  %61 = vst [vmem:[#allocation6] sm:$0xff] %v45_v4  ;;  %62 = vst [vmem:[#allocation6 + $0x8] sm:$0xff] %v46_v5  ;;  %v51_v16 = vmul.f32 %v44_v0, %v34_v13  ;;  %v52_v17 = vmul.f32 %v44_v0, %v35_v14  ;;  %v37_v19 = vld [vmem:[#allocation3 + $0x48] sm:$0xff]  ;;  %p121_p8 = scmp.ne.s32.totalorder %s83_s1, %s120_s25  ;;  %p126_p10 = scmp.lt.s32.totalorder %s120_s25, %s120_s25 }
  0x17   :  { %63 = vst [vmem:[#allocation6 + $0x10] sm:$0xff] %v47_v6  ;;  %v53_v18 = vmul.f32 %v44_v0, %v36_v15  ;;  %v38_v20 = vld [vmem:[#allocation3 + $0x50] sm:$0xff]  ;;  %v39_v21 = vld [vmem:[#allocation3 + $0x58] sm:$0xff]  ;;  %64 = vst [vmem:[#allocation6 + $0x18] sm:$0xff] %v48_v10  ;;  %v54_v22 = vmul.f32 %v44_v0, %v37_v19 }
  0x18   :  { %65 = vst [vmem:[#allocation6 + $0x20] sm:$0xff] %v49_v11  ;;  %66 = vst [vmem:[#allocation6 + $0x28] sm:$0xff] %v50_v12  ;;  %v55_v23 = vmul.f32 %v44_v0, %v38_v20  ;;  %v56_v24 = vmul.f32 %v44_v0, %v39_v21  ;;  %v40_v25 = vld [vmem:[#allocation3 + $0x60] sm:$0xff]  ;;  %v41_v26 = vld [vmem:[#allocation3 + $0x68] sm:$0xff]  ;;  %p127_p11 = por %p126_p10, %p125_p9 }
  0x19   :  { %v42_v27 = vld [vmem:[#allocation3 + $0x70] sm:$0xff]  ;;  %67 = vst [vmem:[#allocation6 + $0x30] sm:$0xff] %v51_v16  ;;  %68 = vst [vmem:[#allocation6 + $0x38] sm:$0xff] %v52_v17  ;;  %v57_v28 = vmul.f32 %v44_v0, %v40_v25  ;;  %v58_v29 = vmul.f32 %v44_v0, %v41_v26  ;;  %v43_v31 = vld [vmem:[#allocation3 + $0x78] sm:$0x1f] }
  0x1a   :  { %69 = vst [vmem:[#allocation6 + $0x40] sm:$0xff] %v53_v18  ;;  %v59_v30 = vmul.f32 %v44_v0, %v42_v27  ;;  %70 = vst [vmem:[#allocation6 + $0x48] sm:$0xff] %v54_v22  ;;  %v60_v32 = vmul.f32 %v44_v0, %v43_v31  ;;  %p128_p12 = pnand %p127_p11, %p121_p8 }
  0x1b   :  { %71 = vst [vmem:[#allocation6 + $0x50] sm:$0xff] %v55_v23  ;;  %72 = vst [vmem:[#allocation6 + $0x58] sm:$0xff] %v56_v24 }
  0x1c   :  { %73 = vst [vmem:[#allocation6 + $0x60] sm:$0xff] %v57_v28  ;;  %74 = vst [vmem:[#allocation6 + $0x68] sm:$0xff] %v58_v29 }
  0x1d   :  { %75 = vst [vmem:[#allocation6 + $0x70] sm:$0xff] %v59_v30  ;;  %76 = vst [vmem:[#allocation6 + $0x78] sm:$0x1f] %v60_v32 }
  0x1e   :  { %131 = shalt.err (!%p128_p12)
}
  0x1f   :  { %s132_s28 = scalar_lea.hbm %s200_s2, 2048 }
  0x20   :  { %p133_p13 = scmp.ne.s32.totalorder %s200_s2, %s132_s28  ;;  %p136_p0 = scmp.lt.u32.totalorder %s132_s28, %s200_s2 }
  0x22   :  { %p138_p1 = pnand %p136_p0, %p133_p13 }
  0x24   :  { %141 = shalt.err (!%p138_p1)
}
  0x25   :  { %88 = dma.vmem_to_hbm [thread:$0]  %s83_s1, 2048, %s200_s2, [#allocation5], %s147_s19, %s147_s19, %s148_s20  }
  0x26   :  { %144 = dma.done.wait [#allocation5], 2048  }
  0x27   :  { %145 = vsyncadd [#allocation5], 4294965248 }
  0x28   :  { %92 = vsyncpa [#allocation4], 1 }
  0x29   :  { %93 = vsyncpa [#allocation5], 1 }

</bundles_post_ra>
